<compile_context>
chip_gen: v7x
topology: tpu7x:2x2x1
jax: 0.10.0
libtpu: 0.0.40
codegen_flags: <defaults>
</compile_context>

<pallas_src>
import jax
import jax.numpy as jnp
from jax.experimental import pallas as pl
from jax.experimental.pallas import tpu as pltpu

LANE = 128


def _round_up(n, m):
    return (n + m - 1) // m * m


# ---------------------------------------------------------------------------
# Pallas kernel: fused 3-layer MLP for one batch tile
#   h1 = relu(x @ W1 + b1)
#   h2 = relu(h1 @ W2 + b2)
#   y  = h2 @ W3 + b3
# MXU operands are bf16; accumulation and the bias/ReLU epilogue are f32.
# ---------------------------------------------------------------------------
def _mlp_kernel(x_ref, w1_ref, w2_ref, w3_ref, b1_ref, b2_ref, b3_ref, o_ref):
    h = jnp.dot(x_ref[...], w1_ref[...], preferred_element_type=jnp.float32)
    h = jnp.maximum(h + b1_ref[...], 0.0)
    h = jnp.dot(h.astype(jnp.bfloat16), w2_ref[...],
                preferred_element_type=jnp.float32)
    h = jnp.maximum(h + b2_ref[...], 0.0)
    y = jnp.dot(h.astype(jnp.bfloat16), w3_ref[...],
                preferred_element_type=jnp.float32)
    o_ref[...] = y + b3_ref[...]


# ---------------------------------------------------------------------------
# Parameter initialization (PyTorch-default-like uniform init, [out, in] layout)
# ---------------------------------------------------------------------------
def init_params(key, input_size, nf=100, num_classes=10):
    def linear_p(k, nin, nout):
        kw, kb = jax.random.split(k)
        bound = 1.0 / (nin ** 0.5)
        w = jax.random.uniform(kw, (nout, nin), jnp.float32, -bound, bound)
        b = jax.random.uniform(kb, (nout,), jnp.float32, -bound, bound)
        return w, b

    k1, k2, k3 = jax.random.split(key, 3)
    return {
        'fc1': linear_p(k1, input_size, nf),
        'fc2': linear_p(k2, nf, nf),
        'linear': linear_p(k3, nf, num_classes),
    }


# ---------------------------------------------------------------------------
# One-time weight prep (hoisted out of the per-call path):
#   transpose to [in, out], zero-pad every feature dim to a multiple of 128
#   (lane-dense stores), cast weights to bf16. Padded W columns/rows and bias
#   entries are exact zeros, so padded hidden lanes stay exactly 0 and the
#   math is unchanged.
# ---------------------------------------------------------------------------
def pack_params(params):
    w1, b1 = params['fc1']
    w2, b2 = params['fc2']
    w3, b3 = params['linear']
    nf, din = w1.shape
    nc = w3.shape[0]
    Kp = _round_up(din, LANE)
    Hp = _round_up(nf, LANE)
    Cp = _round_up(nc, LANE)

    def pad_w(w, rows, cols):
        wt = jnp.transpose(w).astype(jnp.bfloat16)        # [in, out], bf16
        return jnp.pad(wt, ((0, rows - wt.shape[0]), (0, cols - wt.shape[1])))

    def pad_b(b, cols):
        return jnp.pad(b.astype(jnp.float32),
                       (0, cols - b.shape[0])).reshape(1, cols)

    return {
        'w1': pad_w(w1, Kp, Hp), 'b1': pad_b(b1, Hp),
        'w2': pad_w(w2, Hp, Hp), 'b2': pad_b(b2, Hp),
        'w3': pad_w(w3, Hp, Cp), 'b3': pad_b(b3, Cp),
    }


# ---------------------------------------------------------------------------
# Per-call path: only pads the activations (bf16), tiles the batch, launches.
# ---------------------------------------------------------------------------
def fused_mlp(x2d, packed, num_classes):
    B, din = x2d.shape
    Kp, Hp = packed['w1'].shape
    Cp = packed['w3'].shape[1]

    # Batch tile: at least 8 sublanes, capped at 512 rows per grid step.
    TM = min(512, _round_up(B, 8))
    Mp = _round_up(B, TM)

    # Cast to bf16 BEFORE padding: single, half-width activation pass.
    xp = jnp.pad(x2d.astype(jnp.bfloat16), ((0, Mp - B), (0, Kp - din)))

    # Advisory cost model (helps XLA schedule around the custom call).
    flops = 2 * Mp * (Kp * Hp + Hp * Hp + Hp * Cp)
    bytes_accessed = (Mp * Kp * 2 + Mp * Cp * 4
                      + (Kp * Hp + Hp * Hp + Hp * Cp) * 2
                      + (2 * Hp + Cp) * 4)
    cost = pl.CostEstimate(flops=flops, transcendentals=0,
                           bytes_accessed=bytes_accessed)

    # VMEM budget guard (matters on v7x: 64 MiB physical / ~32 MiB scoped
    # default). Double-buffered weights/biases/x/out tiles + f32 temporaries.
    vmem_bytes = (2 * (Kp * Hp + Hp * Hp + Hp * Cp) * 2   # bf16 weights, x2 buf
                  + 2 * (2 * Hp + Cp) * 4                 # f32 biases, x2 buf
                  + 2 * TM * Kp * 2                       # x tile bf16, x2 buf
                  + 2 * TM * Cp * 4                       # out tile f32, x2 buf
                  + 2 * TM * Hp * 4)                      # f32 hidden temporaries
    vmem_limit = None
    if int(1.5 * vmem_bytes) > (32 << 20):
        vmem_limit = min(int(1.5 * vmem_bytes), 64 << 20)

    out = pl.pallas_call(
        _mlp_kernel,
        out_shape=jax.ShapeDtypeStruct((Mp, Cp), jnp.float32),
        grid=(Mp // TM,),
        in_specs=[
            pl.BlockSpec((TM, Kp), lambda i: (i, 0)),   # x tile (pipelined over M)
            pl.BlockSpec((Kp, Hp), lambda i: (0, 0)),   # W1 (constant block -> fetched once)
            pl.BlockSpec((Hp, Hp), lambda i: (0, 0)),   # W2
            pl.BlockSpec((Hp, Cp), lambda i: (0, 0)),   # W3
            pl.BlockSpec((1, Hp), lambda i: (0, 0)),    # b1
            pl.BlockSpec((1, Hp), lambda i: (0, 0)),    # b2
            pl.BlockSpec((1, Cp), lambda i: (0, 0)),    # b3
        ],
        out_specs=pl.BlockSpec((TM, Cp), lambda i: (i, 0)),
        compiler_params=pltpu.CompilerParams(
            dimension_semantics=("parallel",),
            vmem_limit_bytes=vmem_limit),
        cost_estimate=cost,
    )(xp, packed['w1'], packed['w2'], packed['w3'],
      packed['b1'], packed['b2'], packed['b3'])

    return out[:B, :num_classes]


# ---------------------------------------------------------------------------
# Forward pass (matches MLP.forward in eval mode)
# ---------------------------------------------------------------------------
def forward(packed, x, num_classes=10):
    B = x.shape[0]
    x2d = x.reshape(B, -1)            # x.view(-1, input_size)
    # Dropout layers are eval-mode identity.
    # TODO(synk): training-mode dropout (PRNG masking via pltpu.prng_*) is not implemented.
    return fused_mlp(x2d, packed, num_classes)


# Pure-JAX f32 reference (mirrors the PyTorch module) for tolerance checking.
def reference_forward(params, x):
    B = x.shape[0]
    x2d = x.reshape(B, -1)
    w1, b1 = params['fc1']
    w2, b2 = params['fc2']
    w3, b3 = params['linear']
    h = jnp.maximum(x2d @ w1.T + b1, 0.0)
    h = jnp.maximum(h @ w2.T + b2, 0.0)
    return h @ w3.T + b3


if __name__ == "__main__":
    key = jax.random.PRNGKey(0)
    pkey, xkey = jax.random.split(key)
    # Input like PyTorch: [B, C, H, W]; input_size = prod(args.input_size) = 1024.
    B, C, H, W = 2, 4, 16, 16
    input_size = C * H * W
    num_classes = 10

    params = init_params(pkey, input_size, nf=100, num_classes=num_classes)
    # One-time weight prep (outside the per-call hot path).
    packed = jax.tree_util.tree_map(jax.block_until_ready, pack_params(params))

    x = jax.random.normal(xkey, (B, C, H, W), dtype=jnp.float32)

    fwd = jax.jit(forward, static_argnames="num_classes")
    logits = jax.block_until_ready(fwd(packed, x, num_classes=num_classes))

    assert logits.shape == (B, num_classes), logits.shape
    assert jnp.all(jnp.isfinite(logits))

    ref = reference_forward(params, x)
    assert jnp.allclose(logits, ref, atol=5e-2, rtol=5e-2), (
        float(jnp.max(jnp.abs(logits - ref))))
    print("KERNEL_OK")
</pallas_src>

<mosaic_0001>
module attributes {stable_mosaic.version = 11 : i64} {
  func.func @_mlp_kernel(%arg0: i32, %arg1: memref<8x1024xbf16, #tpu.memory_space<vmem>>, %arg2: memref<1024x128xbf16, #tpu.memory_space<vmem>>, %arg3: memref<128x128xbf16, #tpu.memory_space<vmem>>, %arg4: memref<128x128xbf16, #tpu.memory_space<vmem>>, %arg5: memref<1x128xf32, #tpu.memory_space<vmem>>, %arg6: memref<1x128xf32, #tpu.memory_space<vmem>>, %arg7: memref<1x128xf32, #tpu.memory_space<vmem>>, %arg8: memref<8x128xf32, #tpu.memory_space<vmem>>) attributes {dimension_semantics = [#tpu.dimension_semantics<parallel>], iteration_bounds = array<i64: 1>, scalar_prefetch = 0 : i64, scratch_operands = 0 : i64, tpu.core_type = #tpu.core_type<tc>, window_params = [{transform_indices = @transform_0, window_bounds = array<i64: 8, 1024>}, {pipeline_mode = #tpu.pipeline_mode<synchronous>, transform_indices = @transform_1, window_bounds = array<i64: 1024, 128>}, {pipeline_mode = #tpu.pipeline_mode<synchronous>, transform_indices = @transform_2, window_bounds = array<i64: 128, 128>}, {pipeline_mode = #tpu.pipeline_mode<synchronous>, transform_indices = @transform_3, window_bounds = array<i64: 128, 128>}, {pipeline_mode = #tpu.pipeline_mode<synchronous>, transform_indices = @transform_4, window_bounds = array<i64: 1, 128>}, {pipeline_mode = #tpu.pipeline_mode<synchronous>, transform_indices = @transform_5, window_bounds = array<i64: 1, 128>}, {pipeline_mode = #tpu.pipeline_mode<synchronous>, transform_indices = @transform_6, window_bounds = array<i64: 1, 128>}, {transform_indices = @transform_7, window_bounds = array<i64: 8, 128>}]} {
    %c0 = arith.constant 0 : index
    %c0_0 = arith.constant 0 : index
    %0 = vector.load %arg1[%c0, %c0_0] : memref<8x1024xbf16, #tpu.memory_space<vmem>>, vector<8x1024xbf16>
    %c0_1 = arith.constant 0 : index
    %c0_2 = arith.constant 0 : index
    %1 = vector.load %arg2[%c0_1, %c0_2] : memref<1024x128xbf16, #tpu.memory_space<vmem>>, vector<1024x128xbf16>
    %cst = arith.constant dense<0.000000e+00> : vector<8x128xf32>
    %2 = tpu.matmul %0, %1, %cst {dimension_numbers = #tpu.dot_dimension_numbers<[1], [0], [0], [1], [0, 0, 1, 1], [], []>} : vector<8x1024xbf16>, vector<1024x128xbf16>, vector<8x128xf32> -> vector<8x128xf32>
    %c0_3 = arith.constant 0 : index
    %c0_4 = arith.constant 0 : index
    %3 = vector.load %arg5[%c0_3, %c0_4] : memref<1x128xf32, #tpu.memory_space<vmem>>, vector<1x128xf32>
    %4 = vector.broadcast %3 : vector<1x128xf32> to vector<8x128xf32>
    %5 = arith.addf %2, %4 : vector<8x128xf32>
    %cst_5 = arith.constant 0.000000e+00 : f32
    %6 = vector.broadcast %cst_5 : f32 to vector<8x128xf32>
    %7 = arith.maximumf %5, %6 : vector<8x128xf32>
    %8 = arith.truncf %7 : vector<8x128xf32> to vector<8x128xbf16>
    %c0_6 = arith.constant 0 : index
    %c0_7 = arith.constant 0 : index
    %9 = vector.load %arg3[%c0_6, %c0_7] : memref<128x128xbf16, #tpu.memory_space<vmem>>, vector<128x128xbf16>
    %cst_8 = arith.constant dense<0.000000e+00> : vector<8x128xf32>
    %10 = tpu.matmul %8, %9, %cst_8 {dimension_numbers = #tpu.dot_dimension_numbers<[1], [0], [0], [1], [0, 0, 1, 1], [], []>} : vector<8x128xbf16>, vector<128x128xbf16>, vector<8x128xf32> -> vector<8x128xf32>
    %c0_9 = arith.constant 0 : index
    %c0_10 = arith.constant 0 : index
    %11 = vector.load %arg6[%c0_9, %c0_10] : memref<1x128xf32, #tpu.memory_space<vmem>>, vector<1x128xf32>
    %12 = vector.broadcast %11 : vector<1x128xf32> to vector<8x128xf32>
    %13 = arith.addf %10, %12 : vector<8x128xf32>
    %cst_11 = arith.constant 0.000000e+00 : f32
    %14 = vector.broadcast %cst_11 : f32 to vector<8x128xf32>
    %15 = arith.maximumf %13, %14 : vector<8x128xf32>
    %16 = arith.truncf %15 : vector<8x128xf32> to vector<8x128xbf16>
    %c0_12 = arith.constant 0 : index
    %c0_13 = arith.constant 0 : index
    %17 = vector.load %arg4[%c0_12, %c0_13] : memref<128x128xbf16, #tpu.memory_space<vmem>>, vector<128x128xbf16>
    %cst_14 = arith.constant dense<0.000000e+00> : vector<8x128xf32>
    %18 = tpu.matmul %16, %17, %cst_14 {dimension_numbers = #tpu.dot_dimension_numbers<[1], [0], [0], [1], [0, 0, 1, 1], [], []>} : vector<8x128xbf16>, vector<128x128xbf16>, vector<8x128xf32> -> vector<8x128xf32>
    %c0_15 = arith.constant 0 : index
    %c0_16 = arith.constant 0 : index
    %19 = vector.load %arg7[%c0_15, %c0_16] : memref<1x128xf32, #tpu.memory_space<vmem>>, vector<1x128xf32>
    %20 = vector.broadcast %19 : vector<1x128xf32> to vector<8x128xf32>
    %21 = arith.addf %18, %20 : vector<8x128xf32>
    %c0_17 = arith.constant 0 : index
    %c0_18 = arith.constant 0 : index
    %22 = vector.load %arg8[%c0_17, %c0_18] : memref<8x128xf32, #tpu.memory_space<vmem>>, vector<8x128xf32>
    tpu.vector_store %arg8[%c0_17, %c0_18], %21 {strides = array<i32>} : memref<8x128xf32, #tpu.memory_space<vmem>>, vector<8x128xf32>,
    return
  }
  func.func @transform_0(%arg0: i32) -> (i32, i32) {
    %c0_i32 = arith.constant 0 : i32
    %c0_i32_0 = arith.constant 0 : i32
    return %arg0, %c0_i32 : i32, i32
  }
  func.func @transform_1(%arg0: i32) -> (i32, i32) {
    %c0_i32 = arith.constant 0 : i32
    %c0_i32_0 = arith.constant 0 : i32
    %c0_i32_1 = arith.constant 0 : i32
    return %c0_i32, %c0_i32_0 : i32, i32
  }
  func.func @transform_2(%arg0: i32) -> (i32, i32) {
    %c0_i32 = arith.constant 0 : i32
    %c0_i32_0 = arith.constant 0 : i32
    %c0_i32_1 = arith.constant 0 : i32
    return %c0_i32, %c0_i32_0 : i32, i32
  }
  func.func @transform_3(%arg0: i32) -> (i32, i32) {
    %c0_i32 = arith.constant 0 : i32
    %c0_i32_0 = arith.constant 0 : i32
    %c0_i32_1 = arith.constant 0 : i32
    return %c0_i32, %c0_i32_0 : i32, i32
  }
  func.func @transform_4(%arg0: i32) -> (i32, i32) {
    %c0_i32 = arith.constant 0 : i32
    %c0_i32_0 = arith.constant 0 : i32
    %c0_i32_1 = arith.constant 0 : i32
    return %c0_i32, %c0_i32_0 : i32, i32
  }
  func.func @transform_5(%arg0: i32) -> (i32, i32) {
    %c0_i32 = arith.constant 0 : i32
    %c0_i32_0 = arith.constant 0 : i32
    %c0_i32_1 = arith.constant 0 : i32
    return %c0_i32, %c0_i32_0 : i32, i32
  }
  func.func @transform_6(%arg0: i32) -> (i32, i32) {
    %c0_i32 = arith.constant 0 : i32
    %c0_i32_0 = arith.constant 0 : i32
    %c0_i32_1 = arith.constant 0 : i32
    return %c0_i32, %c0_i32_0 : i32, i32
  }
  func.func @transform_7(%arg0: i32) -> (i32, i32) {
    %c0_i32 = arith.constant 0 : i32
    %c0_i32_0 = arith.constant 0 : i32
    return %arg0, %c0_i32 : i32, i32
  }
}

</mosaic_0001>

<bundles_post_ra>
// kernel: forward.1
= control target key start
LH: loop header
LB: loop body
LE: loop exit
PB: predicated region body
PF: predicated region fallthrough
CT: control target
= control target key end

     0   :  { %12 = vsyncpa [#allocation3], 0  ;;  %s1338_s24 = smov [#allocation2]   ;;  %s1485_s0 = inlined_call_operand.vmem [shape: bf16[8,1024], index: 0, kind: input, shape index: {}]   ;;  %s1486_s1 = inlined_call_operand.hbm [shape: bf16[1024,128], index: 1, kind: input, shape index: {}]   ;;  %s1487_s2 = inlined_call_operand.vmem [shape: bf16[128,128], index: 2, kind: input, shape index: {}]   ;;  %s1488_s3 = inlined_call_operand.vmem [shape: bf16[128,128], index: 3, kind: input, shape index: {}]   ;;  %s1489_s4 = inlined_call_operand.vmem [shape: f32[1,128], index: 4, kind: input, shape index: {}]   ;;  %s1490_s5 = inlined_call_operand.vmem [shape: f32[1,128], index: 5, kind: input, shape index: {}]   ;;  %s1491_s6 = inlined_call_operand.vmem [shape: f32[1,128], index: 6, kind: input, shape index: {}]   ;;  %s1492_s7 = inlined_call_operand.vmem [shape: f32[8,128], index: 7, kind: output, shape index: {}]  }
   0x1   :  { %s20_s25 = sshll.u32 %s1338_s24, 4  ;;  %s1314_s28 = scalar_lea.hbm %s1486_s1, 8192  ;;  %s21_s25 = int_to_ptr.vmem [resolvable:$true] %s20_s25 }
   0x2   :  { %p1315_p0 = scmp.ne.s32.totalorder %s1486_s1, %s1314_s28  ;;  %p1318_p1 = scmp.lt.u32.totalorder %s1314_s28, %s1486_s1 }
   0x4   :  { %p1320_p2 = pnand %p1318_p1, %p1315_p0 }
   0x6   :  { %1323 = shalt.err (!%p1320_p2)
}
   0x7   :  { %s1324_s10 = scalar_lea.vmem %s21_s25, 8192  ;;  %p1329_p4 = scmp.lt.s32.totalorder %s21_s25, %s21_s25 }
   0x8   :  { %p1325_p3 = scmp.ne.s32.totalorder %s21_s25, %s1324_s10  ;;  %p1330_p5 = scmp.lt.s32.totalorder %s1324_s10, %s1324_s10 }
   0xa   :  { %p1331_p6 = por %p1330_p5, %p1329_p4 }
   0xc   :  { %p1332_p7 = pnand %p1331_p6, %p1325_p3 }
   0xe   :  { %1335 = shalt.err (!%p1332_p7)
}
   0xf   :  { %s1339_s11 = smov 64   ;;  %s1340_s12 = smov 4  }
  0x10   :  { %26 = dma.hbm_to_vmem [thread:$0]  %s1486_s1, 8192, %s21_s25, [#allocation3], %s1339_s11, %s1339_s11, %s1340_s12  }
  0x11   :  { %1336 = dma.done.wait [#allocation3], 8192  }
  0x12   :  { %1337 = vsyncadd [#allocation3], 4294959104  ;;  %v1226_v0 = vld [vmem:[#allocation2 + $0x40] sm:$0xff]   ;;  %v1230_v4 = vld [vmem:[#allocation2 + $0x48] sm:$0xff]   ;;  %vm1342_vm0 = vmmov 0  }
  0x13   :  { %v1227_v1 = vld [vmem:[#allocation2 + $0xc0] sm:$0xff]   ;;  %1075 = vmatprep.subr.bf16.mxu0 %v1226_v0  ;;  %v1231_v5 = vld [vmem:[#allocation2 + $0xc8] sm:$0xff]   ;;  %v1234_v8 = vld [vmem:[#allocation2 + $0x50] sm:$0xff]  }
  0x14   :  { %v1228_v2 = vld [vmem:[#allocation2] sm:$0xff]   ;;  %1097 = vmatprep.subr.bf16.mxu1 %v1227_v1  ;;  %v1232_v6 = vld [vmem:[#allocation2 + $0x8] sm:$0xff]   ;;  %v1235_v9 = vld [vmem:[#allocation2 + $0xd0] sm:$0xff]  }
  0x15   :  { %v1229_v3 = vld [vmem:[#allocation2 + $0x80] sm:$0xff]   ;;  %1076 = vmatpush3.bf16.msra.mxu0 %v1228_v2  ;;  %v1233_v7 = vld [vmem:[#allocation2 + $0x88] sm:$0xff]   ;;  %v1236_v10 = vld [vmem:[#allocation2 + $0x10] sm:$0xff]  }
  0x16   :  { %1098 = vmatpush3.bf16.msra.mxu1 %v1229_v3  ;;  %1077 = vmatprep.subr.bf16.mxu0 %v1230_v4  ;;  %v1237_v11 = vld [vmem:[#allocation2 + $0x90] sm:$0xff]   ;;  %v1238_v12 = vld [vmem:[#allocation2 + $0x58] sm:$0xff]   ;;  %v1242_v16 = vld [vmem:[#allocation2 + $0x60] sm:$0xff]  }
  0x17   :  { %1099 = vmatprep.subr.bf16.mxu1 %v1231_v5  ;;  %v1239_v13 = vld [vmem:[#allocation2 + $0xd8] sm:$0xff]   ;;  %v1243_v17 = vld [vmem:[#allocation2 + $0xe0] sm:$0xff]   ;;  %v1246_v20 = vld [vmem:[#allocation2 + $0x68] sm:$0xff]  }
  0x18   :  { %v1240_v14 = vld [vmem:[#allocation2 + $0x18] sm:$0xff]   ;;  %v1244_v18 = vld [vmem:[#allocation2 + $0x20] sm:$0xff]   ;;  %v1247_v21 = vld [vmem:[#allocation2 + $0xe8] sm:$0xff]  }
  0x19   :  { %1078 = vmatpush3.bf16.msra.mxu0 %v1232_v6  ;;  %v1241_v15 = vld [vmem:[#allocation2 + $0x98] sm:$0xff]   ;;  %v1245_v19 = vld [vmem:[#allocation2 + $0xa0] sm:$0xff]   ;;  %v1248_v22 = vld [vmem:[#allocation2 + $0x28] sm:$0xff]  }
  0x1a   :  { %1100 = vmatpush3.bf16.msra.mxu1 %v1233_v7  ;;  %1079 = vmatprep.subr.bf16.mxu0 %v1234_v8  ;;  %v1249_v23 = vld [vmem:[#allocation2 + $0xa8] sm:$0xff]   ;;  %v1250_v24 = vld [vmem:[#allocation2 + $0x70] sm:$0xff]   ;;  %v1254_v28 = vld [vmem:[#allocation2 + $0x78] sm:$0xff]  }
  0x1b   :  { %1101 = vmatprep.subr.bf16.mxu1 %v1235_v9  ;;  %v1251_v25 = vld [vmem:[#allocation2 + $0xf0] sm:$0xff]   ;;  %v1255_v29 = vld [vmem:[#allocation2 + $0xf8] sm:$0xff]   ;;  %v41_v32 = vld [vmem:[%s1485_s0] sm:$0xff] }
  0x1c   :  { %v1252_v26 = vld [vmem:[#allocation2 + $0x30] sm:$0xff]   ;;  %v1256_v30 = vld [vmem:[#allocation2 + $0x38] sm:$0xff]   ;;  %v42_v33 = vld [vmem:[%s1485_s0 + $0x8] sm:$0xff]  ;;  %v985_v34 = vcombine.low %v41_v32, %v41_v32  ;;  %v986_v35 = vcombine.high %v41_v32, %v41_v32 }
  0x1d   :  { %1080 = vmatpush3.bf16.msra.mxu0 %v1236_v10  ;;  %v1253_v27 = vld [vmem:[#allocation2 + $0xb0] sm:$0xff]   ;;  %v1257_v31 = vld [vmem:[#allocation2 + $0xb8] sm:$0xff]   ;;  %v987_v36 = vcombine.low %v42_v33, %v42_v33  ;;  %v988_v37 = vcombine.high %v42_v33, %v42_v33  ;;  %v1262_v38 = vld [vmem:[#allocation2 + $0x140] sm:$0xff]  }
  0x1e   :  { %1102 = vmatpush3.bf16.msra.mxu1 %v1237_v11  ;;  %1081 = vmatprep.subr.bf16.mxu0 %v1238_v12  ;;  %v1263_v39 = vld [vmem:[#allocation2 + $0x1c0] sm:$0xff]   ;;  %v1266_v42 = vld [vmem:[#allocation2 + $0x148] sm:$0xff]   ;;  %v1270_v46 = vld [vmem:[#allocation2 + $0x150] sm:$0xff]  }
  0x1f   :  { %1103 = vmatprep.subr.bf16.mxu1 %v1239_v13  ;;  %624 = vmatprep.mubr.bf16.mxu0 %v986_v35  ;;  %v1264_v40 = vld [vmem:[#allocation2 + $0x100] sm:$0xff]   ;;  %v1267_v43 = vld [vmem:[#allocation2 + $0x1c8] sm:$0xff]   ;;  %v1271_v47 = vld [vmem:[#allocation2 + $0x1d0] sm:$0xff]   ;;  %v1341_v13 = vmov 0.0  }
  0x20   :  { %664 = vmatprep.mubr.bf16.mxu1 %v988_v37  ;;  %v1265_v41 = vld [vmem:[#allocation2 + $0x180] sm:$0xff]   ;;  %v1268_v44 = vld [vmem:[#allocation2 + $0x108] sm:$0xff]   ;;  %v1272_v48 = vld [vmem:[#allocation2 + $0x110] sm:$0xff]  }
  0x21   :  { %1082 = vmatpush3.bf16.msra.mxu0 %v1240_v14  ;;  %v1269_v45 = vld [vmem:[#allocation2 + $0x188] sm:$0xff]   ;;  %v1273_v49 = vld [vmem:[#allocation2 + $0x190] sm:$0xff]   ;;  %v1274_v50 = vld [vmem:[#allocation2 + $0x158] sm:$0xff]  }
  0x22   :  { %1104 = vmatpush3.bf16.msra.mxu1 %v1241_v15  ;;  %1083 = vmatprep.subr.bf16.mxu0 %v1242_v16  ;;  %v1275_v51 = vld [vmem:[#allocation2 + $0x1d8] sm:$0xff]   ;;  %v1278_v54 = vld [vmem:[#allocation2 + $0x160] sm:$0xff]   ;;  %v1282_v58 = vld [vmem:[#allocation2 + $0x168] sm:$0xff]  }
  0x23   :  { %1105 = vmatprep.subr.bf16.mxu1 %v1243_v17  ;;  %v1276_v52 = vld [vmem:[#allocation2 + $0x118] sm:$0xff]   ;;  %v1279_v55 = vld [vmem:[#allocation2 + $0x1e0] sm:$0xff]   ;;  %v1283_v59 = vld [vmem:[#allocation2 + $0x1e8] sm:$0xff]  }
  0x24   :  { %v1277_v53 = vld [vmem:[#allocation2 + $0x198] sm:$0xff]   ;;  %v1280_v56 = vld [vmem:[#allocation2 + $0x120] sm:$0xff]   ;;  %v1284_v60 = vld [vmem:[#allocation2 + $0x128] sm:$0xff]  }
  0x25   :  { %1084 = vmatpush3.bf16.msra.mxu0 %v1244_v18  ;;  %v1281_v57 = vld [vmem:[#allocation2 + $0x1a0] sm:$0xff]   ;;  %v1285_v61 = vld [vmem:[#allocation2 + $0x1a8] sm:$0xff]   ;;  %v1286_v62 = vld [vmem:[#allocation2 + $0x170] sm:$0xff]  }
  0x26   :  { %1106 = vmatpush3.bf16.msra.mxu1 %v1245_v19  ;;  %1085 = vmatprep.subr.bf16.mxu0 %v1246_v20  ;;  %v1287_v63 = vld [vmem:[#allocation2 + $0x1f0] sm:$0xff]   ;;  %v1290_v2 = vld [vmem:[#allocation2 + $0x178] sm:$0xff]   ;;  %v1298_v12 = vld [vmem:[%s1487_s2] sm:$0xff]  }
  0x27   :  { %1107 = vmatprep.subr.bf16.mxu1 %v1247_v21  ;;  %v1288_v0 = vld [vmem:[#allocation2 + $0x130] sm:$0xff]   ;;  %v1291_v3 = vld [vmem:[#allocation2 + $0x1f8] sm:$0xff]   ;;  %v1299_v14 = vld [vmem:[%s1487_s2 + $0x8] sm:$0xff]  }
  0x28   :  { %v1289_v1 = vld [vmem:[#allocation2 + $0x1b0] sm:$0xff]   ;;  %v1292_v4 = vld [vmem:[#allocation2 + $0x138] sm:$0xff]   ;;  %v1302_v17 = vld [vmem:[%s1487_s2 + $0x20] sm:$0xff]  }
  0x29   :  { %1086 = vmatpush3.bf16.msra.mxu0 %v1248_v22  ;;  %v1293_v5 = vld [vmem:[#allocation2 + $0x1b8] sm:$0xff]   ;;  %v43_v6 = vld [vmem:[%s1485_s0 + $0x10] sm:$0xff]  ;;  %v1303_v18 = vld [vmem:[%s1487_s2 + $0x28] sm:$0xff]  }
  0x2a   :  { %1108 = vmatpush3.bf16.msra.mxu1 %v1249_v23  ;;  %1087 = vmatprep.subr.bf16.mxu0 %v1250_v24  ;;  %v989_v7 = vcombine.low %v43_v6, %v43_v6  ;;  %v990_v8 = vcombine.high %v43_v6, %v43_v6  ;;  %v44_v9 = vld [vmem:[%s1485_s0 + $0x18] sm:$0xff]  ;;  %v1300_v15 = vld [vmem:[%s1487_s2 + $0x10] sm:$0xff]   ;;  %v1306_v21 = vld [vmem:[%s1488_s3] sm:$0xff]  }
  0x2b   :  { %1109 = vmatprep.subr.bf16.mxu1 %v1251_v25  ;;  %v991_v10 = vcombine.low %v44_v9, %v44_v9  ;;  %v992_v11 = vcombine.high %v44_v9, %v44_v9  ;;  %v1301_v16 = vld [vmem:[%s1487_s2 + $0x18] sm:$0xff]   ;;  %v1304_v19 = vld [vmem:[%s1487_s2 + $0x30] sm:$0xff]   ;;  %v1307_v22 = vld [vmem:[%s1488_s3 + $0x8] sm:$0xff]  }
  0x2c   :  { %v1305_v20 = vld [vmem:[%s1487_s2 + $0x38] sm:$0xff]   ;;  %v1308_v23 = vld [vmem:[%s1488_s3 + $0x10] sm:$0xff]   ;;  %v1310_v25 = vld [vmem:[%s1488_s3 + $0x20] sm:$0xff]  }
  0x2d   :  { %1088 = vmatpush3.bf16.msra.mxu0 %v1252_v26  ;;  %v1309_v24 = vld [vmem:[%s1488_s3 + $0x18] sm:$0xff]   ;;  %v1311_v26 = vld [vmem:[%s1488_s3 + $0x28] sm:$0xff]  }
  0x2e   :  { %1110 = vmatpush3.bf16.msra.mxu1 %v1253_v27  ;;  %1089 = vmatprep.subr.bf16.mxu0 %v1254_v28 }
  0x2f   :  { %1111 = vmatprep.subr.bf16.mxu1 %v1255_v29  ;;  %v984_v29 = vld [vmem:[%s1489_s4] ss:$0 sm:$0xff] }
  0x31   :  { %1090 = vmatpush3.bf16.msra.mxu0 %v1256_v30 }
  0x32   :  { %1112 = vmatpush3.bf16.msra.mxu1 %v1257_v31  ;;  %1119 = vmatprep.subr.bf16.mxu0 %v1262_v38 }
  0x33   :  { %1141 = vmatprep.subr.bf16.mxu1 %v1263_v39 }
  0x34   :  { %625 = vmatmul.mubr.bf16.vlgmr.msra.gmra.mrb[0].mxu0 %v985_v34 }
  0x35   :  { %665 = vmatmul.mubr.bf16.vlgmr.msra.gmra.mrb[0].mxu1 %v987_v36  ;;  %1120 = vmatpush3.bf16.msra.mxu0 %v1264_v40 }
  0x36   :  { %1142 = vmatpush3.bf16.msra.mxu1 %v1265_v41  ;;  %1121 = vmatprep.subr.bf16.mxu0 %v1266_v42 }
  0x37   :  { %1143 = vmatprep.subr.bf16.mxu1 %v1267_v43  ;;  %704 = vmatprep.mubr.bf16.mxu0 %v990_v8 }
  0x38   :  { %744 = vmatprep.mubr.bf16.mxu1 %v992_v11 }
  0x39   :  { %1122 = vmatpush3.bf16.msra.mxu0 %v1268_v44 }
  0x3a   :  { %1144 = vmatpush3.bf16.msra.mxu1 %v1269_v45  ;;  %1123 = vmatprep.subr.bf16.mxu0 %v1270_v46 }
  0x3b   :  { %1145 = vmatprep.subr.bf16.mxu1 %v1271_v47 }
  0x3d   :  { %1124 = vmatpush3.bf16.msra.mxu0 %v1272_v48 }
  0x3e   :  { %1146 = vmatpush3.bf16.msra.mxu1 %v1273_v49  ;;  %1125 = vmatprep.subr.bf16.mxu0 %v1274_v50 }
  0x3f   :  { %1147 = vmatprep.subr.bf16.mxu1 %v1275_v51 }
  0x41   :  { %1126 = vmatpush3.bf16.msra.mxu0 %v1276_v52 }
  0x42   :  { %1148 = vmatpush3.bf16.msra.mxu1 %v1277_v53  ;;  %1127 = vmatprep.subr.bf16.mxu0 %v1278_v54  ;;  %v1312_v54 = vld [vmem:[%s1488_s3 + $0x30] sm:$0xff]  }
  0x43   :  { %1149 = vmatprep.subr.bf16.mxu1 %v1279_v55  ;;  %v1313_v55 = vld [vmem:[%s1488_s3 + $0x38] sm:$0xff]  }
  0x45   :  { %1128 = vmatpush3.bf16.msra.mxu0 %v1280_v56  ;;  %v1057_v56 = vld [vmem:[%s1490_s5] ss:$0 sm:$0xff] }
  0x46   :  { %1150 = vmatpush3.bf16.msra.mxu1 %v1281_v57  ;;  %1129 = vmatprep.subr.bf16.mxu0 %v1282_v58 }
  0x47   :  { %1151 = vmatprep.subr.bf16.mxu1 %v1283_v59 }
  0x49   :  { %1130 = vmatpush3.bf16.msra.mxu0 %v1284_v60 }
  0x4a   :  { %1152 = vmatpush3.bf16.msra.mxu1 %v1285_v61  ;;  %1131 = vmatprep.subr.bf16.mxu0 %v1286_v62 }
  0x4b   :  { %1153 = vmatprep.subr.bf16.mxu1 %v1287_v63 }
  0x4d   :  { %1132 = vmatpush3.bf16.msra.mxu0 %v1288_v0  ;;  %v1066_v0 = vld [vmem:[%s1491_s6] ss:$0 sm:$0xff] }
  0x4e   :  { %1154 = vmatpush3.bf16.msra.mxu1 %v1289_v1  ;;  %1133 = vmatprep.subr.bf16.mxu0 %v1290_v2 }
  0x4f   :  { %1155 = vmatprep.subr.bf16.mxu1 %v1291_v3 }
  0x51   :  { %1134 = vmatpush3.bf16.msra.mxu0 %v1292_v4 }
  0x52   :  { %1156 = vmatpush3.bf16.msra.mxu1 %v1293_v5  ;;  %1181 = vmatprep.subr.bf16.mxu0 %v1341_v13 }
  0x53   :  { %1201 = vmatprep.subr.bf16.mxu1 %v1341_v13 }
  0x54   :  { %705 = vmatmul.mubr.bf16.vlgmr.msra.gmra.mrb[4].mxu0 %v989_v7 }
  0x55   :  { %745 = vmatmul.mubr.bf16.vlgmr.msra.gmra.mrb[4].mxu1 %v991_v10  ;;  %1182 = vmatpush3.bf16.msra.mxu0 %v1298_v12 }
  0x56   :  { %1183 = vmatprep.subr.bf16.mxu0 %v1341_v13  ;;  %1197 = vmatprep.mubr.msk.bf16.mxu0 %vm1342_vm0, %v1341_v13 }
  0x57   :  { %1217 = vmatprep.mubr.msk.bf16.mxu1 %vm1342_vm0, %v1341_v13  ;;  %1202 = vmatpush3.bf16.msra.mxu1 %v1306_v21 }
  0x58   :  { %1203 = vmatprep.subr.bf16.mxu1 %v1341_v13 }
  0x59   :  { %1184 = vmatpush3.bf16.msra.mxu0 %v1299_v14 }
  0x5a   :  { %1185 = vmatprep.subr.bf16.mxu0 %v1341_v13 }
  0x5b   :  { %1204 = vmatpush3.bf16.msra.mxu1 %v1307_v22 }
  0x5c   :  { %1205 = vmatprep.subr.bf16.mxu1 %v1341_v13 }
  0x5d   :  { %1186 = vmatpush3.bf16.msra.mxu0 %v1300_v15 }
  0x5e   :  { %1187 = vmatprep.subr.bf16.mxu0 %v1341_v13 }
  0x5f   :  { %1206 = vmatpush3.bf16.msra.mxu1 %v1308_v23 }
  0x60   :  { %1207 = vmatprep.subr.bf16.mxu1 %v1341_v13 }
  0x61   :  { %1188 = vmatpush3.bf16.msra.mxu0 %v1301_v16 }
  0x62   :  { %1189 = vmatprep.subr.bf16.mxu0 %v1341_v13 }
  0x63   :  { %1208 = vmatpush3.bf16.msra.mxu1 %v1309_v24 }
  0x64   :  { %1209 = vmatprep.subr.bf16.mxu1 %v1341_v13 }
  0x65   :  { %1190 = vmatpush3.bf16.msra.mxu0 %v1302_v17 }
  0x66   :  { %1191 = vmatprep.subr.bf16.mxu0 %v1341_v13 }
  0x67   :  { %1210 = vmatpush3.bf16.msra.mxu1 %v1310_v25 }
  0x68   :  { %1211 = vmatprep.subr.bf16.mxu1 %v1341_v13 }
  0x69   :  { %1192 = vmatpush3.bf16.msra.mxu0 %v1303_v18 }
  0x6a   :  { %1193 = vmatprep.subr.bf16.mxu0 %v1341_v13 }
  0x6b   :  { %1212 = vmatpush3.bf16.msra.mxu1 %v1311_v26 }
  0x6c   :  { %1213 = vmatprep.subr.bf16.mxu1 %v1341_v13 }
  0x6d   :  { %1194 = vmatpush3.bf16.msra.mxu0 %v1304_v19 }
  0x6e   :  { %1195 = vmatprep.subr.bf16.mxu0 %v1341_v13 }
  0x6f   :  { %1214 = vmatpush3.bf16.msra.mxu1 %v1312_v54 }
  0x70   :  { %1215 = vmatprep.subr.bf16.mxu1 %v1341_v13 }
  0x71   :  { %1196 = vmatpush3.bf16.msra.mxu0 %v1305_v20 }
  0x73   :  { %1216 = vmatpush3.bf16.msra.mxu1 %v1313_v55 }
 0x107   :  { %v1091_v27 = vpop.f32.mrb[0].mxu0 }
 0x108   :  { %v1113_v28 = vpop.f32.mrb[0].mxu1  ;;  %v1092_v30 = vpop.f32.mrb[1].mxu0 }
 0x109   :  { %v1114_v31 = vpop.f32.mrb[1].mxu1  ;;  %v1093_v32 = vadd.f32 %v1092_v30, %v1091_v27  ;;  %v1094_v34 = vpop.f32.mrb[2].mxu0 }
 0x10a   :  { %v1115_v33 = vadd.f32 %v1114_v31, %v1113_v28  ;;  %v1116_v35 = vpop.f32.mrb[2].mxu1  ;;  %v1095_v36 = vpop.f32.mrb[3].mxu0 }
 0x10b   :  { %v1117_v37 = vpop.f32.mrb[3].mxu1  ;;  %v627_v38 = vadd.f32 %v1093_v32, %v984_v29 }
 0x10d   :  { %v667_v39 = vadd.f32 %v1115_v33, %v627_v38 }
 0x127   :  { %v1135_v40 = vpop.f32.mrb[4].mxu0 }
 0x128   :  { %v1157_v41 = vpop.f32.mrb[4].mxu1  ;;  %v1136_v42 = vpop.f32.mrb[5].mxu0 }
 0x129   :  { %v1158_v43 = vpop.f32.mrb[5].mxu1  ;;  %v1137_v44 = vadd.f32 %v1136_v42, %v1135_v40  ;;  %v1138_v46 = vpop.f32.mrb[6].mxu0 }
 0x12a   :  { %v1159_v45 = vadd.f32 %v1158_v43, %v1157_v41  ;;  %v1160_v47 = vpop.f32.mrb[6].mxu1  ;;  %v1139_v48 = vpop.f32.mrb[7].mxu0 }
 0x12b   :  { %v1161_v49 = vpop.f32.mrb[7].mxu1  ;;  %v707_v50 = vadd.f32 %v1137_v44, %v667_v39 }
 0x12d   :  { %v747_v51 = vadd.f32 %v1159_v45, %v707_v50 }
 0x12f   :  { %v752_v52 = vmax.f32 %v747_v51, 0.0 }
 0x131   :  { %v753_v53 = vpack.c.bf16 %v752_v52, %v752_v52 }
 0x133   :  { %1198 = vmatmul.mubr.bf16.vlgmr.msra.gmra.mrb[8].mxu0 %v753_v53 }
 0x206   :  { %v859_v57 = vpop.f32.mrb[8].mxu0 }
 0x207   :  { %v860_v58 = vadd.f32 %v1057_v56, %v859_v57  ;;  %v1199_v59 = vpop.f32.mrb[9].mxu0 }
 0x208   :  { %v862_v60 = vpop.f32.mrb[10].mxu0 }
 0x209   :  { %v865_v61 = vmax.f32 %v860_v58, 0.0  ;;  %v1200_v62 = vpop.f32.mrb[11].mxu0 }
 0x20b   :  { %v866_v63 = vpack.c.bf16 %v865_v61, %v865_v61 }
 0x20d   :  { %1218 = vmatmul.mubr.bf16.vlgmr.msra.gmra.mrb[8].mxu1 %v866_v63 }
 0x2e0   :  { %v972_v1 = vpop.f32.mrb[8].mxu1 }
 0x2e1   :  { %v973_v2 = vadd.f32 %v1066_v0, %v972_v1  ;;  %v1219_v3 = vpop.f32.mrb[9].mxu1 }
 0x2e2   :  { %v975_v4 = vpop.f32.mrb[10].mxu1 }
 0x2e3   :  { %978 = vst [vmem:[%s1492_s7] sm:$0xff] %v973_v2  ;;  %v1220_v5 = vpop.f32.mrb[11].mxu1 }
 0x2e4   :  { %983 = vsyncpa [#allocation3], 1 }

</bundles_post_ra>
